<compile_context>
chip_gen: v5e
topology: v5e:2x2
jax: 0.10.0
libtpu: 0.0.40
codegen_flags: <defaults>
</compile_context>

<pallas_src>
import jax
import jax.numpy as jnp
from jax.experimental import pallas as pl
from jax.experimental.pallas import tpu as pltpu


def _round_up(v, m):
    return (v + m - 1) // m * m


def _default_target_block_bytes():
    # ~8 MiB blocks where VMEM is 128 MiB (v5e/v6e), ~4 MiB on smaller-VMEM chips
    # (v7x, 64 MiB).  Best-effort hardware query; falls back to 4 MiB.
    try:
        info = pltpu.get_tpu_info()
        vmem = int(getattr(info, "vmem_capacity_bytes", 0) or 0)
    except Exception:
        vmem = 0
    return (8 << 20) if vmem >= (96 << 20) else (4 << 20)


def _choose_tiling(C, HW, itemsize, target_bytes):
    """Pick (c_tile, tile_hw, num_k, block_bytes).

    tile_hw is a multiple of 128 unless it equals the full HW (single tile);
    c_tile is either C (full dim) or a multiple of 8.  block_bytes accounts for
    VMEM sublane padding.
    """
    sub = 8 * (4 // itemsize)                      # sublane pack: f32->8, bf16->16, i8->32
    # Channel tile: keep full C unless that blows the target even at 1024 lanes.
    max_ct = max(8, (target_bytes // (1024 * itemsize)) // 8 * 8)
    c_tile = C if C <= max_ct else int(max_ct)
    eff_c = _round_up(c_tile, sub)                 # VMEM sublane padding
    # Spatial tile, multiple of 128, sized so eff_c * tile_hw * itemsize ~ target.
    lanes128 = pl.cdiv(HW, 128)
    groups = max(1, target_bytes // (eff_c * 128 * itemsize))
    groups = min(int(groups), int(lanes128))
    tile_hw = groups * 128
    if tile_hw >= HW:
        tile_hw = HW                               # single spatial tile: block == full dim
    num_k = pl.cdiv(HW, tile_hw)
    block_bytes = eff_c * _round_up(tile_hw, 128) * itemsize
    return int(c_tile), int(tile_hw), int(num_k), int(block_bytes)


def image_pool(x, weight, bias, *, target_block_bytes=None):
    """x: (N, C, H, W). weight: (C, C) (from Conv2d (C, C, 1, 1)). bias: (C,)."""
    N, C, H, W = x.shape
    HW = H * W
    itemsize = jnp.dtype(x.dtype).itemsize
    if target_block_bytes is None:
        target_block_bytes = _default_target_block_bytes()

    c_tile, tile_hw, num_k, block_bytes = _choose_tiling(C, HW, itemsize,
                                                         target_block_bytes)
    nct = pl.cdiv(C, c_tile)

    # Split the pass-1 spatial reduction into P parallel slabs so both v7x
    # TensorCores participate even when N == 1 and there is a single channel tile.
    P = 2 if (num_k >= 2 and N * nct < 2) else 1
    k_per_slab = pl.cdiv(num_k, P)
    need_clamp = P * k_per_slab > num_k            # padding slab tiles exist
    needs_mask = (HW % tile_hw != 0) or need_clamp

    x3 = x.reshape(N, C, HW)                       # free view; no pad, no copy

    vmem_limit = int(min(48 << 20, max(16 << 20, 2 * block_bytes + (4 << 20))))
    io_bytes = int(N * C * HW * itemsize)

    # ---------- Pass 1: streaming per-channel partial-sum reduction ----------
    def sum_kernel(x_ref, sum_ref):
        k = pl.program_id(3)
        xv = x_ref[...].astype(jnp.float32)
        if needs_mask:
            p = pl.program_id(1)
            start = (p * k_per_slab + k) * tile_hw
            pos = jax.lax.broadcasted_iota(jnp.int32, (1, 1, tile_hw), 2) + start
            xv = jnp.where(pos < HW, xv, 0.0)      # mask trailing / padding tiles
        partial = jnp.sum(xv, axis=2, keepdims=True)          # (1, c_tile, 1)

        @pl.when(k == 0)
        def _():
            sum_ref[...] = partial

        @pl.when(k > 0)
        def _():
            sum_ref[...] = sum_ref[...] + partial

    def x_index_map(n, p, c, k):
        kb = p * k_per_slab + k
        if need_clamp:
            kb = jnp.minimum(kb, num_k - 1)        # padding tiles re-read last block,
        return (n, c, kb)                          # fully masked -> contribute zero

    sums = pl.pallas_call(
        sum_kernel,
        out_shape=jax.ShapeDtypeStruct((N * P, C, 1), jnp.float32),
        grid_spec=pltpu.PrefetchScalarGridSpec(
            num_scalar_prefetch=0,
            grid=(N, P, nct, k_per_slab),
            in_specs=[pl.BlockSpec((1, c_tile, tile_hw), x_index_map)],
            out_specs=pl.BlockSpec((1, c_tile, 1),
                                   lambda n, p, c, k: (n * P + p, c, 0)),
        ),
        compiler_params=pltpu.CompilerParams(
            dimension_semantics=("parallel", "parallel", "parallel", "arbitrary"),
            vmem_limit_bytes=vmem_limit),
        cost_estimate=pl.CostEstimate(
            flops=int(N * C * HW), transcendentals=0,
            bytes_accessed=io_bytes + int(N * P * C * 4)),
    )(x3)

    # ---------- Tiny (N,C)@(C,C) 1x1-conv GEMM hoisted to plain XLA ----------
    # Divide by the *true* H*W so masking never biases the mean.
    mean = sums.reshape(N, P, C).sum(axis=1) * (1.0 / HW)              # (N, C) f32
    y = mean @ weight.astype(jnp.float32).T + bias.astype(jnp.float32)  # (N, C) f32
    y3 = y.reshape(N, C, 1)

    # ---------- Pass 2: broadcast / store pass (pure write bandwidth) ----------
    def bcast_kernel(y_ref, o_ref):
        o_ref[...] = jnp.broadcast_to(y_ref[...].astype(o_ref.dtype), o_ref.shape)

    out3 = pl.pallas_call(
        bcast_kernel,
        out_shape=jax.ShapeDtypeStruct((N, C, HW), x.dtype),
        grid_spec=pltpu.PrefetchScalarGridSpec(
            num_scalar_prefetch=0,
            grid=(N, nct, num_k),
            in_specs=[pl.BlockSpec((1, c_tile, 1), lambda n, c, k: (n, c, 0))],
            out_specs=pl.BlockSpec((1, c_tile, tile_hw), lambda n, c, k: (n, c, k)),
        ),
        compiler_params=pltpu.CompilerParams(
            dimension_semantics=("parallel", "parallel", "parallel"),
            vmem_limit_bytes=vmem_limit),
        cost_estimate=pl.CostEstimate(
            flops=0, transcendentals=0,
            bytes_accessed=io_bytes + int(N * C * 4)),
    )(y3)

    return out3.reshape(N, C, H, W)                # free view


def image_pool_ref(x, weight, bias):
    # Pure-JAX reference of the PyTorch forward.
    pooled = jnp.mean(x.astype(jnp.float32), axis=(2, 3))               # (N, C)
    y = pooled @ weight.astype(jnp.float32).T + bias.astype(jnp.float32)
    N, C, H, W = x.shape
    return jnp.broadcast_to(y[:, :, None, None], (N, C, H, W)).astype(x.dtype)


if __name__ == "__main__":
    key = jax.random.PRNGKey(0)

    def make_case(k, N, C, H, W, dtype):
        kx, kw, kb = jax.random.split(k, 3)
        x = jax.random.normal(kx, (N, C, H, W), dtype=jnp.float32).astype(dtype)
        bound = 1.0 / jnp.sqrt(jnp.float32(C))
        w = jax.random.uniform(kw, (C, C), minval=-bound, maxval=bound,
                               dtype=jnp.float32)
        b = jax.random.uniform(kb, (C,), minval=-bound, maxval=bound,
                               dtype=jnp.float32)
        return x, w, b

    cases = [
        # (N, C, H, W), dtype, target_block_bytes override, tol
        ((2, 4, 16, 16), jnp.float32, None, 1e-5),       # baseline small case
        ((1, 8, 9, 9), jnp.float32, None, 1e-5),          # HW % 128 != 0, single tile
        ((1, 8, 96, 96), jnp.float32, 64 * 1024, 1e-5),   # multi-tile + mask + P=2 + clamp
        ((2, 16, 33, 33), jnp.bfloat16, None, 2e-2),      # bf16, non-128 HW
    ]
    keys = jax.random.split(key, len(cases))
    for (shape, dtype, tgt, tol), k in zip(cases, keys):
        x, w, b = make_case(k, *shape, dtype)
        out = jax.block_until_ready(image_pool(x, w, b, target_block_bytes=tgt))
        ref = image_pool_ref(x, w, b)
        assert out.shape == x.shape and out.dtype == x.dtype
        assert jnp.allclose(out.astype(jnp.float32), ref.astype(jnp.float32),
                            atol=tol, rtol=tol), f"mismatch for case {shape} {dtype}"

    print("KERNEL_OK")
</pallas_src>

<mosaic_0001>
module attributes {stable_mosaic.version = 11 : i64} {
  func.func @sum_kernel(%arg0: i32, %arg1: i32, %arg2: i32, %arg3: i32, %arg4: memref<1x4x256xf32, #tpu.memory_space<vmem>>, %arg5: memref<1x4x1xf32, #tpu.memory_space<vmem>>) attributes {dimension_semantics = [#tpu.dimension_semantics<parallel>, #tpu.dimension_semantics<parallel>, #tpu.dimension_semantics<parallel>, #tpu.dimension_semantics<arbitrary>], iteration_bounds = array<i64: 2, 1, 1, 1>, scalar_prefetch = 0 : i64, scratch_operands = 0 : i64, tpu.core_type = #tpu.core_type<tc>, window_params = [{transform_indices = @transform_0, window_bounds = array<i64: 1, 4, 256>}, {transform_indices = @transform_1, window_bounds = array<i64: 1, 4, 1>}]} {
    %c0 = arith.constant 0 : index
    %c0_0 = arith.constant 0 : index
    %c0_1 = arith.constant 0 : index
    %0 = vector.load %arg4[%c0, %c0_0, %c0_1] : memref<1x4x256xf32, #tpu.memory_space<vmem>>, vector<1x4x256xf32>
    %cst = arith.constant dense<0.000000e+00> : vector<1x4xf32>
    %1 = vector.multi_reduction <add>, %0, %cst [2] : vector<1x4x256xf32> to vector<1x4xf32>
    %2 = vector.shape_cast %1 : vector<1x4xf32> to vector<1x4x1xf32>
    %c0_i32 = arith.constant 0 : i32
    %3 = arith.cmpi eq, %arg3, %c0_i32 : i32
    %4 = arith.extui %3 : i1 to i32
    %c0_i32_2 = arith.constant 0 : i32
    %5 = arith.cmpi ne, %4, %c0_i32_2 : i32
    scf.if %5 {
      %c0_5 = arith.constant 0 : index
      %c0_6 = arith.constant 0 : index
      %c0_7 = arith.constant 0 : index
      %9 = vector.load %arg5[%c0_5, %c0_6, %c0_7] : memref<1x4x1xf32, #tpu.memory_space<vmem>>, vector<1x4x1xf32>
      tpu.vector_store %arg5[%c0_5, %c0_6, %c0_7], %2 {strides = array<i32>} : memref<1x4x1xf32, #tpu.memory_space<vmem>>, vector<1x4x1xf32>,
    } else {
    }
    %c0_i32_3 = arith.constant 0 : i32
    %6 = arith.cmpi sgt, %arg3, %c0_i32_3 : i32
    %7 = arith.extui %6 : i1 to i32
    %c0_i32_4 = arith.constant 0 : i32
    %8 = arith.cmpi ne, %7, %c0_i32_4 : i32
    scf.if %8 {
      %c0_5 = arith.constant 0 : index
      %c0_6 = arith.constant 0 : index
      %c0_7 = arith.constant 0 : index
      %9 = vector.load %arg5[%c0_5, %c0_6, %c0_7] : memref<1x4x1xf32, #tpu.memory_space<vmem>>, vector<1x4x1xf32>
      %10 = arith.addf %9, %2 : vector<1x4x1xf32>
      %c0_8 = arith.constant 0 : index
      %c0_9 = arith.constant 0 : index
      %c0_10 = arith.constant 0 : index
      %11 = vector.load %arg5[%c0_8, %c0_9, %c0_10] : memref<1x4x1xf32, #tpu.memory_space<vmem>>, vector<1x4x1xf32>
      tpu.vector_store %arg5[%c0_8, %c0_9, %c0_10], %10 {strides = array<i32>} : memref<1x4x1xf32, #tpu.memory_space<vmem>>, vector<1x4x1xf32>,
    } else {
    }
    return
  }
  func.func @transform_0(%arg0: i32, %arg1: i32, %arg2: i32, %arg3: i32) -> (i32, i32, i32) {
    %c1_i32 = arith.constant 1 : i32
    %0 = arith.muli %arg1, %c1_i32 : i32
    %1 = arith.addi %0, %arg3 : i32
    %c0_i32 = arith.constant 0 : i32
    return %arg0, %arg2, %1 : i32, i32, i32
  }
  func.func @transform_1(%arg0: i32, %arg1: i32, %arg2: i32, %arg3: i32) -> (i32, i32, i32) {
    %c1_i32 = arith.constant 1 : i32
    %0 = arith.muli %arg0, %c1_i32 : i32
    %1 = arith.addi %0, %arg1 : i32
    %c0_i32 = arith.constant 0 : i32
    %c0_i32_0 = arith.constant 0 : i32
    return %1, %arg2, %c0_i32 : i32, i32, i32
  }
}

</mosaic_0001>

<bundles_post_ra>
// kernel: tpu_custom_call.1
= control target key start
LH: loop header
LB: loop body
LE: loop exit
PB: predicated region body
PF: predicated region fallthrough
CT: control target
= control target key end

     0   :  { %6 = vsyncpa [#allocation3], 0  ;;  %s560_s0 = inlined_call_operand.hbm [shape: f32[2,4,256], index: 0, kind: input, shape index: {}]   ;;  %s561_s1 = inlined_call_operand.vmem [shape: f32[2,4,1], index: 1, kind: output, shape index: {}]  }
   0x1   :  { %8 = vsyncpa [#allocation3 + $0x1], 0  ;;  %s472_s6 = smov 0   ;;  %s474_s7 = smov 0  }
   0x2   :  { %s476_s8 = smov 0   ;;  %s478_s9 = smov 0  }
   0x3   :  { %s480_s10 = smov 0   ;;  %s482_s11 = smov 0  }
   0x4 LB: > { %s312_s12 = sadd.s32 4294967295, %s460_s11   ;;  %s40_s13 = sadd.s32 1, %s456_s10  ;;  %s460_s11 = sphi %s482_s11, %s14_s11   ;;  %s456_s10 = sphi %s480_s10, %s568_s10   ;;  %s452_s9 = sphi %s478_s9, %s567_s9   ;;  %s448_s8 = sphi %s476_s8, %s566_s8   ;;  %s444_s7 = sphi %s474_s7, %s565_s7   ;;  %s440_s6 = sphi %s472_s6, %s564_s6  }
   0x5   : > { %p42_p0 = scmp.ge.s32.totalorder %s40_s13, 2  ;;  %s53_s14 = sadd.s32 1, %s448_s8 }
   0x6   : > { %p60_p1 = scmp.ne.s32.totalorder %s448_s8, %s444_s7  ;;  %p61_p2 = scmp.eq.s32.totalorder %s460_s11, 0 }
   0x7   : > { %s570_s13 = smov (%p42_p0, %s40_s13), 0  ;;  %p66_p4 = scmp.ne.s32.totalorder %s444_s7, %s440_s6 }
   0x8   : > { %p508_p3 = por %p61_p2, %p60_p1  ;;  %s46_s16 = ssub.s32 %s456_s10, %s570_s13 }
   0x9   : > { %p67_p5 = scmp.eq.s32.totalorder %s312_s12, 0  ;;  %p51_p6 = scmp.eq.s32.totalorder %s46_s16, 0 }
   0xa   : > { %p331_p8 = scmp.lt.s32.totalorder %s460_s11, 2  ;;  %s120_s19 = sand.u32 1, %s448_s8  }
   0xb   : > { %p515_p7 = por %p67_p5, %p66_p4  ;;  %s324_s20 = sshll.u32 %s456_s10, 3 }
   0xc   : > { %s521_s18 = scalar_select %p51_p6, %s448_s8, %s53_s14  }
   0xd   : > { %s316_s21 = sshll.u32 %s120_s19, 3  ;;  %s134_s24 = scalar_lea.hbm %s560_s0, %s324_s20 }
   0xe   : > { %s136_s25 = sshll.u32 %s134_s24, 4  ;;  %s124_s26 = scalar_lea.vmem [#allocation2], %s316_s21  ;;  %s137_s25 = int_to_ptr.hbm [resolvable:$true] %s136_s25 }
   0xf   : > { %s138_s27 = sshll.u32 %s124_s26, 4  ;;  %p328_p9 = pnand %p331_p8, %p508_p3  ;;  %s139_s27 = int_to_ptr.vmem [resolvable:$true] %s138_s27 }
  0x10   : > { %p319_p10 = scmp.ge.s32.totalorder %s460_s11, 1  ;;  %p143_p11 = scmp.lt.s32.totalorder %s460_s11, 3 }
  0x11   : > { %s121_s28 = scalar_lea.sflag [#allocation3], %s120_s19 }
  0x12   : > { %330 = dma.hbm_to_vmem [thread:$0]  (!%p328_p9), %s137_s25, 128, %s139_s27, %s121_s28  }
  0x13   : > { %p144_p12 = pnand %p319_p10, %p143_p11 }
  0x14   : > { %s149_s29 = sand.u32 (!%p144_p12), 1, %s444_s7  }
  0x15   : > { %147 = sbr.rel (%p144_p12) target bundleno = 156 (0x9c), region = 24  ;;  %s320_s30 = sshll.u32 (!%p144_p12), %s149_s29, 3 }
  0x16   : > { %s150_s2 = scalar_lea.sflag (!%p144_p12), [#allocation3], %s149_s29  ;;  %s153_s3 = scalar_lea.vmem (!%p144_p12), [#allocation2], %s320_s30 }
  0x1a   : > { %435 = dma.done.wait (%p515_p7), %s150_s2, 128  }
  0x1b   : > { %437 = vsyncadd (%p515_p7), %s150_s2, 4294967168  ;;  %v187_v0 = vld [vmem:[%s153_s3] sm:$0xff]  ;;  %vm194_vm0 = vcmask 1043456   ;;  %p179_p13 = scmp.lt.s32.totalorder %s452_s9, 1  ;;  %vm204_vm1 = vcmask 3072  }
  0x1c   : > { %189 = vst [vmem:[#allocation1] ss:$2 sm:$0xff] %v187_v0 }
  0x1d   : > { %s572_s9 = smov (!%p179_p13, %s452_s9), 1 }
  0x1e   : > { %s321_s4 = sshll.u32 %s572_s9, 2 }
  0x1f   : > { %s185_s12 = scalar_lea.vmem %s561_s1, %s321_s4 }
  0x23   : > { %v190_v1 = vld.sshfl [vmem:[#allocation1] sm:$0xff pattern:$0x75316420]  ;;  %v191_v2 = vld.sshfl [vmem:[#allocation1 + $0x8] sm:$0xff pattern:$0x75316420] }
  0x24   : > { %v195_v3 = vsel %vm194_vm0, %v190_v1, 0.0  ;;  %v196_v4 = vsel %vm194_vm0, %v191_v2, 0.0 }
  0x25   : > { %v197_v5 = vadd.f32 %v196_v4, %v195_v3 }
  0x27   : > { %198 = vadd.xlane.f32.xlu0 %v197_v5 }
  0x9a   : > { %v199_v6 = vpop.xlane.xlu0 %198 }
  0x9b   : > { %205 = vst.msk [vmem:[%s185_s12] sm:$0xf] %vm204_vm1, %v199_v6 }
  0x9c PF: > { %s14_s11 = sadd.s32 1, %s460_s11   ;;  %s564_s6 = smov %s444_s7 }
  0x9d   : > { %p11_p0 = scmp.ge.s32.totalorder %s14_s11, 4   ;;  %s565_s7 = smov %s448_s8 }
  0x9e   : > { %s566_s8 = smov %s521_s18  ;;  %s567_s9 = smov %s456_s10 }
  0x9f   : > { %s568_s10 = smov %s570_s13  ;;  %13 = sbr.rel (!%p11_p0) target bundleno = 4 (0x4), region = 72 }
  0xa4   :  { %242 = vsyncpa [#allocation3], 1 }
  0xa5   :  { %244 = vsyncpa [#allocation3 + $0x1], 1 }

</bundles_post_ra>
